<compile_context>
chip_gen: v7x
topology: tpu7x:2x2x1
jax: 0.10.0
libtpu: 0.0.40
codegen_flags: <defaults>
</compile_context>

<pallas_src>
import functools

import jax
import jax.numpy as jnp
from jax.experimental import pallas as pl
from jax.experimental.pallas import tpu as pltpu


def _mrl_fused_kernel(x_ref, *out_refs, dims):
    # x_ref: (TILE_B, in_cols) tile of the input (only the columns any output needs).
    # out_refs[k]: (TILE_B, dims[k]) tile of the k-th nested output.
    # dims are static Python ints -> static slices, pure vreg copies (no compute).
    for o_ref, dim in zip(out_refs, dims):
        if dim == x_ref.shape[1]:
            o_ref[...] = x_ref[...]
        else:
            o_ref[...] = x_ref[:, :dim]


def mrl_layer(x, mrl_nested_dim):
    """Pallas implementation of MRLLayer.forward.

    Args:
      x: (batch, hidden) array.
      mrl_nested_dim: list of ints, each <= hidden.

    Returns:
      list of (batch, dim) arrays, in the order of mrl_nested_dim.
    """
    batch, hidden = x.shape
    for d in mrl_nested_dim:
        assert 0 < d <= hidden, f"nested dim {d} out of range for hidden={hidden}"

    results = [None] * len(mrl_nested_dim)

    # dim == hidden: x[:, :hidden] is x itself -> no copy needed (arrays are immutable).
    copy_idx = [i for i, d in enumerate(mrl_nested_dim) if d != hidden]
    for i, d in enumerate(mrl_nested_dim):
        if d == hidden:
            results[i] = x
    if not copy_idx:
        return results

    copy_dims = tuple(mrl_nested_dim[i] for i in copy_idx)
    itemsize = jnp.dtype(x.dtype).itemsize
    sublane = max(8, 32 // itemsize)  # 8 for f32, 16 for bf16, 32 for int8

    # Trim the input block: only the columns any output needs, rounded up to a
    # lane-aligned (multiple-of-128) width, capped at the full hidden dim.
    max_dim = max(copy_dims)
    in_cols = min(hidden, ((max_dim + 127) // 128) * 128)

    # ---- Per-generation VMEM budget (pure HBM-bandwidth kernel: bigger tile == faster) ----
    # v5e/v6e have 128 MiB VMEM per TensorCore, v7x has 64 MiB. Target ~48 MiB of tile
    # buffers on v5e/v6e and ~38 MiB on v7x, and raise the scoped limit accordingly.
    default_phys = 64 * 1024 * 1024  # conservative fallback (v7x per-TC size)
    try:
        info = pltpu.get_tpu_info()
        phys_vmem = int(getattr(info, "vmem_capacity_bytes", default_phys))
    except Exception:  # no TPU info available at trace time -> stay conservative
        phys_vmem = default_phys
    vmem_budget = min(48 * 1024 * 1024, (phys_vmem * 3) // 5)  # 48 MiB (v5e/v6e), ~38 MiB (v7x)
    vmem_limit = int(min(phys_vmem, vmem_budget + 16 * 1024 * 1024))  # headroom for compiler scratch

    # Batch tile: sized so double-buffered input + all double-buffered output tiles fit
    # in the budget; multiple of the sublane packing factor; capped at 1024 rows (the
    # measured ~86%-of-roofline regime for tiled copies).
    bytes_per_row = 2 * (in_cols + sum(copy_dims)) * itemsize  # 2x for double buffering
    tile_b = max(sublane, min(1024, vmem_budget // max(1, bytes_per_row)))
    tile_b = (tile_b // sublane) * sublane

    # v7x megacore: make sure there are at least 2 grid steps (so the "parallel" row axis
    # can shard across both TensorCores) whenever the batch is big enough to split.
    if batch >= 2 * sublane:
        half_rows = ((pl.cdiv(batch, 2) + sublane - 1) // sublane) * sublane
        tile_b = min(tile_b, half_rows)
    if tile_b >= batch:
        tile_b = batch  # full-extent block is always layout-legal (tiny batches)
    grid = (pl.cdiv(batch, tile_b),)

    # Advisory cost hint: zero FLOPs, pure memory traffic (read trimmed input + write slices).
    bytes_accessed = int(batch * (in_cols + sum(copy_dims)) * itemsize)
    cost = pl.CostEstimate(flops=0, transcendentals=0, bytes_accessed=bytes_accessed)

    kernel = functools.partial(_mrl_fused_kernel, dims=copy_dims)
    outs = pl.pallas_call(
        kernel,
        grid=grid,
        in_specs=[pl.BlockSpec((tile_b, in_cols), lambda i: (i, 0))],
        out_specs=[pl.BlockSpec((tile_b, d), lambda i: (i, 0)) for d in copy_dims],
        out_shape=[jax.ShapeDtypeStruct((batch, d), x.dtype) for d in copy_dims],
        compiler_params=pltpu.CompilerParams(
            dimension_semantics=("parallel",),  # lets v7x shard rows across its 2 TCs
            vmem_limit_bytes=vmem_limit,
        ),
        cost_estimate=cost,
    )(x)
    if not isinstance(outs, (list, tuple)):
        outs = (outs,)
    for i, o in zip(copy_idx, outs):
        results[i] = o
    return results


if __name__ == "__main__":
    key = jax.random.PRNGKey(0)
    # Small shapes: batch=16 exercises the >=2-step row grid; dim==hidden exercises the
    # bypass path; dims 16/32 exercise the fused multi-output copy path.
    batch, hidden = 16, 64
    mrl_nested_dim = [16, 32, 64]

    x = jax.random.normal(key, (batch, hidden), dtype=jnp.float32)

    nested = mrl_layer(x, mrl_nested_dim)
    nested = [jax.block_until_ready(o) for o in nested]

    # Verify against the reference semantics: x[:, :dim]
    for dim, out in zip(mrl_nested_dim, nested):
        ref = x[:, :dim]
        assert out.shape == (batch, dim), (out.shape, (batch, dim))
        assert out.dtype == x.dtype
        assert jnp.array_equal(out, ref), f"mismatch for dim={dim}"

    print("KERNEL_OK")
</pallas_src>

<mosaic_0001>
module attributes {stable_mosaic.version = 11 : i64} {
  func.func @_mrl_fused_kernel(%arg0: i32, %arg1: memref<8x64xf32, #tpu.memory_space<vmem>>, %arg2: memref<8x16xf32, #tpu.memory_space<vmem>>, %arg3: memref<8x32xf32, #tpu.memory_space<vmem>>) attributes {dimension_semantics = [#tpu.dimension_semantics<parallel>], iteration_bounds = array<i64: 2>, scalar_prefetch = 0 : i64, scratch_operands = 0 : i64, tpu.core_type = #tpu.core_type<tc>, window_params = [{transform_indices = @transform_0, window_bounds = array<i64: 8, 64>}, {transform_indices = @transform_1, window_bounds = array<i64: 8, 16>}, {transform_indices = @transform_2, window_bounds = array<i64: 8, 32>}]} {
    %c0 = arith.constant 0 : index
    %c0_0 = arith.constant 0 : index
    %0 = vector.load %arg1[%c0, %c0_0] : memref<8x64xf32, #tpu.memory_space<vmem>>, vector<8x16xf32>
    %c0_1 = arith.constant 0 : index
    %c0_2 = arith.constant 0 : index
    %1 = vector.load %arg2[%c0_1, %c0_2] : memref<8x16xf32, #tpu.memory_space<vmem>>, vector<8x16xf32>
    tpu.vector_store %arg2[%c0_1, %c0_2], %0 {strides = array<i32>} : memref<8x16xf32, #tpu.memory_space<vmem>>, vector<8x16xf32>,
    %c0_3 = arith.constant 0 : index
    %c0_4 = arith.constant 0 : index
    %2 = vector.load %arg1[%c0_3, %c0_4] : memref<8x64xf32, #tpu.memory_space<vmem>>, vector<8x32xf32>
    %c0_5 = arith.constant 0 : index
    %c0_6 = arith.constant 0 : index
    %3 = vector.load %arg3[%c0_5, %c0_6] : memref<8x32xf32, #tpu.memory_space<vmem>>, vector<8x32xf32>
    tpu.vector_store %arg3[%c0_5, %c0_6], %2 {strides = array<i32>} : memref<8x32xf32, #tpu.memory_space<vmem>>, vector<8x32xf32>,
    return
  }
  func.func @transform_0(%arg0: i32) -> (i32, i32) {
    %c0_i32 = arith.constant 0 : i32
    %c0_i32_0 = arith.constant 0 : i32
    return %arg0, %c0_i32 : i32, i32
  }
  func.func @transform_1(%arg0: i32) -> (i32, i32) {
    %c0_i32 = arith.constant 0 : i32
    %c0_i32_0 = arith.constant 0 : i32
    return %arg0, %c0_i32 : i32, i32
  }
  func.func @transform_2(%arg0: i32) -> (i32, i32) {
    %c0_i32 = arith.constant 0 : i32
    %c0_i32_0 = arith.constant 0 : i32
    return %arg0, %c0_i32 : i32, i32
  }
}

</mosaic_0001>

<bundles_post_ra>
// kernel: tpu_custom_call.1
= control target key start
LH: loop header
LB: loop body
LE: loop exit
PB: predicated region body
PF: predicated region fallthrough
CT: control target
= control target key end

     0   :  { %8 = vsyncpa [#allocation3], 0  ;;  %s714_s0 = inlined_call_operand.hbm [shape: f32[16,64], index: 0, kind: input, shape index: {}]   ;;  %s715_s1 = inlined_call_operand.hbm [shape: f32[16,16], index: 1, kind: output, shape index: {0}]   ;;  %s716_s2 = inlined_call_operand.hbm [shape: f32[16,32], index: 2, kind: output, shape index: {1}]  }
   0x1   :  { %10 = vsyncpa [#allocation3 + $0x1], 0 }
   0x2   :  { %11 = vsyncpa [#allocation4], 0 }
   0x3   :  { %13 = vsyncpa [#allocation4 + $0x1], 0 }
   0x4   :  { %14 = vsyncpa [#allocation7], 0 }
   0x5   :  { %16 = vsyncpa [#allocation7 + $0x1], 0  ;;  %s524_s9 = smov 0   ;;  %s526_s10 = smov 0  }
   0x6   :  { %s528_s11 = smov 0   ;;  %s530_s12 = smov 0  }
   0x7 LB: > { %s545_s13 = sadd.s32 4294967295, %s504_s12   ;;  %s310_s14 = sadd.s32 4294967294, %s504_s12   ;;  %s504_s12 = sphi %s530_s12, %s731_s12   ;;  %s500_s11 = sphi %s528_s11, %s730_s11   ;;  %s496_s10 = sphi %s526_s10, %s729_s10   ;;  %s492_s9 = sphi %s524_s9, %s728_s9  }
   0x8   : > { %s549_s15 = sadd.s32 1, %s504_s12   ;;  %s29_s16 = sadd.s32 1, %s500_s11 }
   0x9   : > { %s26_s17 = ssub.s32 %s504_s12, %s549_s15  ;;  %p36_p0 = scmp.ne.s32.totalorder %s500_s11, %s496_s10 }
   0xa   : > { %p27_p1 = scmp.eq.s32.totalorder %s26_s17, 0  ;;  %p37_p2 = scmp.eq.s32.totalorder %s504_s12, 0 }
   0xb   : > { %p42_p3 = scmp.ne.s32.totalorder %s496_s10, %s492_s9  ;;  %p43_p4 = scmp.eq.s32.totalorder %s545_s13, 0 }
   0xc   : > { %s561_s18 = scalar_select %p27_p1, %s500_s11, %s29_s16  }
   0xd   : > { %p563_p5 = por %p37_p2, %p36_p0  ;;  %p567_p6 = por %p43_p4, %p42_p3 }
   0xe   : > { %p66_p7 = scmp.eq.s32.totalorder %s545_s13, 1  ;;  %p72_p8 = scmp.eq.s32.totalorder %s310_s14, 1 }
   0xf   : > { %p342_p10 = scmp.lt.s32.totalorder %s504_s12, 2  ;;  %s118_s23 = sand.u32 1, %s500_s11  }
  0x10   : > { %p574_p11 = por %p66_p7, %p36_p0  ;;  %p578_p12 = por %p72_p8, %p42_p3 }
  0x11   : > { %s314_s24 = sshll.u32 %s504_s12, 7  ;;  %s313_s25 = sshll.u32 %s118_s23, 3 }
  0x12   : > { %s720_s21 = scalar_select %p574_p11, 1, 0 }
  0x13   : > { %s721_s22 = scalar_select %p578_p12, 1, 0 }
  0x14   : > { %s587_s28 = scalar_lea.hbm %s714_s0, %s314_s24  ;;  %s122_s29 = scalar_lea.vmem [#allocation2], %s313_s25 }
  0x15   : > { %s129_s30 = sshll.u32 %s122_s29, 4  ;;  %p591_p13 = pnand %p342_p10, %p563_p5  ;;  %s595_s30 = int_to_ptr.vmem [resolvable:$true] %s129_s30 }
  0x16   : > { %s119_s4 = scalar_lea.sflag [#allocation3], %s118_s23  ;;  %s376_s5 = scalar_lea.hbm %s587_s28, 128 }
  0x17   : > { %p377_p2 = scmp.ne.s32.totalorder %s587_s28, %s376_s5  ;;  %p378_p3 = pneg %p591_p13 }
  0x18   : > { %s381_s8 = scalar_lea.hbm %s714_s0, 256  ;;  %p382_p5 = scmp.lt.u32.totalorder %s587_s28, %s714_s0 }
  0x19   : > { %p379_p4 = pnand %p378_p3, %p377_p2  ;;  %p383_p8 = scmp.lt.u32.totalorder %s381_s8, %s376_s5 }
  0x1a   : > { %p385_p9 = scmp.lt.u32.totalorder %s376_s5, %s587_s28 }
  0x1b   : > { %p380_p7 = pneg %p379_p4  ;;  %p384_p10 = por %p383_p8, %p382_p5 }
  0x1d   : > { %p386_p0 = por %p385_p9, %p384_p10 }
  0x1f   : > { %p387_p1 = pnand %p386_p0, %p380_p7 }
  0x21   : > { %390 = shalt.err (!%p387_p1)
}
  0x22   : > { %s391_s17 = scalar_lea.vmem %s595_s30, 128  ;;  %s506_s19 = smov [#allocation2]  }
  0x23   : > { %p392_p2 = scmp.ne.s32.totalorder %s595_s30, %s391_s17  ;;  %s396_s23 = sshll.u32 %s506_s19, 4  ;;  %s397_s23 = int_to_ptr.vmem [resolvable:$false] %s396_s23 }
  0x24   : > { %s398_s24 = scalar_lea.vmem %s397_s23, 256  ;;  %p399_p11 = scmp.lt.s32.totalorder %s595_s30, %s397_s23 }
  0x25   : > { %p394_p4 = pnand %p392_p2, %p378_p3  ;;  %p400_p5 = scmp.lt.s32.totalorder %s398_s24, %s391_s17 }
  0x27   : > { %p395_p12 = pneg %p394_p4  ;;  %p401_p8 = por %p400_p5, %p399_p11 }
  0x29   : > { %p402_p9 = pnand %p401_p8, %p395_p12 }
  0x2b   : > { %405 = shalt.err (!%p402_p9)
}
  0x2c   : > { %334 = dma.hbm_to_vmem [thread:$0]  (!%p591_p13), %s587_s28, 128, %s595_s30, %s119_s4  }
  0x2d   : > { %p723_p0 = scmp.lt.s32.totalorder %s504_s12, 3  ;;  %p724_p1 = scmp.ge.s32.totalorder %s504_s12, 1 }
  0x2f   : > { %p135_p3 = pnand %p724_p1, %p723_p0 }
  0x30   : > { %s629_s25 = sand.u32 (!%p135_p3), 1, %s496_s10  }
  0x31   : > { %138 = sbr.rel (%p135_p3) target bundleno = 107 (0x6b), region = 24  ;;  %s316_s26 = sshll.u32 (!%p135_p3), %s629_s25, 3 }
  0x32   : > { %s141_s27 = scalar_lea.sflag (!%p135_p3), [#allocation3], %s629_s25  ;;  %s144_s29 = scalar_lea.vmem (!%p135_p3), [#allocation2], %s316_s26 }
  0x38   : > { %479 = dma.done.wait (%p567_p6), %s141_s27, 128  }
  0x39   : > { %481 = vsyncadd (%p567_p6), %s141_s27, 4294967168  ;;  %s162_s28 = scalar_lea.vmem [#allocation5], %s316_s26  ;;  %s169_s3 = scalar_lea.vmem [#allocation6], %s316_s26  ;;  %vm171_vm0 = vcmask 130048   ;;  %vm174_vm1 = vcmask 261120   ;;  %v170_v0 = vld [vmem:[%s144_s29] sm:$0xff] }
  0x3a   : > { %s195_s30 = sshll.u32 %s162_s28, 4  ;;  %s208_s4 = sshll.u32 %s169_s3, 4  ;;  %172 = vst.msk [vmem:[%s162_s28] sm:$0xff] %vm171_vm0, %v170_v0  ;;  %s638_s30 = int_to_ptr.vmem [resolvable:$true] %s195_s30  ;;  %s640_s4 = int_to_ptr.vmem [resolvable:$true] %s208_s4 }
  0x3b   : > { %s321_s5 = sshll.u32 %s545_s13, 7  ;;  %175 = vst.msk [vmem:[%s169_s3] sm:$0xff] %vm174_vm1, %v170_v0  ;;  %s177_s13 = scalar_lea.sflag [#allocation4], %s629_s25 }
  0x3c   : > { %s645_s7 = scalar_lea.hbm %s715_s1, %s321_s5  ;;  %s650_s16 = scalar_lea.hbm %s716_s2, %s321_s5 }
  0x3d   : > { %s406_s17 = scalar_lea.vmem %s638_s30, 128  ;;  %p725_p11 = scmp.ne.s32.totalorder %s720_s21, 0 }
  0x3e   : > { %p407_p6 = scmp.ne.s32.totalorder %s638_s30, %s406_s17  ;;  %s507_s19 = smov [#allocation5]  }
  0x3f   : > { %s410_s23 = sshll.u32 %s507_s19, 4  ;;  %s411_s23 = int_to_ptr.vmem [resolvable:$false] %s410_s23 }
  0x40   : > { %p408_p12 = pnand %p407_p6, %p725_p11  ;;  %s412_s24 = scalar_lea.vmem %s411_s23, 256 }
  0x41   : > { %p413_p7 = scmp.lt.s32.totalorder %s638_s30, %s411_s23  ;;  %p414_p10 = scmp.lt.s32.totalorder %s412_s24, %s406_s17 }
  0x42   : > { %p409_p13 = pneg %p408_p12 }
  0x43   : > { %p415_p2 = por %p414_p10, %p413_p7 }
  0x45   : > { %p416_p4 = pnand %p415_p2, %p409_p13 }
  0x47   : > { %419 = shalt.err (!%p416_p4)
}
  0x48   : > { %s420_s26 = scalar_lea.hbm %s645_s7, 128  ;;  %s424_s28 = scalar_lea.hbm %s715_s1, 256 }
  0x49   : > { %p421_p5 = scmp.ne.s32.totalorder %s645_s7, %s420_s26  ;;  %p425_p0 = scmp.lt.u32.totalorder %s645_s7, %s715_s1 }
  0x4a   : > { %p426_p1 = scmp.lt.u32.totalorder %s424_s28, %s420_s26  ;;  %p428_p6 = scmp.lt.u32.totalorder %s420_s26, %s645_s7 }
  0x4b   : > { %p422_p8 = pnand %p421_p5, %p725_p11 }
  0x4c   : > { %p427_p3 = por %p426_p1, %p425_p0 }
  0x4d   : > { %p423_p9 = pneg %p422_p8 }
  0x4e   : > { %p429_p12 = por %p428_p6, %p427_p3 }
  0x50   : > { %p430_p13 = pnand %p429_p12, %p423_p9 }
  0x52   : > { %433 = shalt.err (!%p430_p13)
}
  0x53   : > { %327 = dma.vmem_to_hbm [thread:$0]  (%p725_p11), %s638_s30, 128, %s645_s7, %s177_s13  }
  0x54   : > { %s182_s6 = scalar_lea.sflag [#allocation7], %s629_s25  ;;  %s434_s20 = scalar_lea.vmem %s640_s4, 128 }
  0x55   : > { %p435_p7 = scmp.ne.s32.totalorder %s640_s4, %s434_s20  ;;  %s508_s8 = smov [#allocation6]  }
  0x56   : > { %s438_s14 = sshll.u32 %s508_s8, 4  ;;  %s439_s14 = int_to_ptr.vmem [resolvable:$false] %s438_s14 }
  0x57   : > { %p436_p10 = pnand %p435_p7, %p725_p11  ;;  %s440_s17 = scalar_lea.vmem %s439_s14, 256 }
  0x58   : > { %p441_p4 = scmp.lt.s32.totalorder %s640_s4, %s439_s14  ;;  %p442_p5 = scmp.lt.s32.totalorder %s440_s17, %s434_s20 }
  0x59   : > { %p437_p2 = pneg %p436_p10 }
  0x5a   : > { %p443_p8 = por %p442_p5, %p441_p4 }
  0x5c   : > { %p444_p9 = pnand %p443_p8, %p437_p2 }
  0x5e   : > { %447 = shalt.err (!%p444_p9)
}
  0x5f   : > { %s448_s25 = scalar_lea.hbm %s650_s16, 128  ;;  %s452_s13 = scalar_lea.hbm %s716_s2, 256 }
  0x60   : > { %p449_p0 = scmp.ne.s32.totalorder %s650_s16, %s448_s25  ;;  %p453_p6 = scmp.lt.u32.totalorder %s650_s16, %s716_s2 }
  0x61   : > { %p454_p12 = scmp.lt.u32.totalorder %s452_s13, %s448_s25  ;;  %p456_p7 = scmp.lt.u32.totalorder %s448_s25, %s650_s16 }
  0x62   : > { %p450_p1 = pnand %p449_p0, %p725_p11 }
  0x63   : > { %p455_p13 = por %p454_p12, %p453_p6 }
  0x64   : > { %p451_p3 = pneg %p450_p1 }
  0x65   : > { %p457_p10 = por %p456_p7, %p455_p13 }
  0x67   : > { %p458_p2 = pnand %p457_p10, %p451_p3 }
  0x69   : > { %461 = shalt.err (!%p458_p2)
}
  0x6a   : > { %328 = dma.vmem_to_hbm [thread:$0]  (%p725_p11), %s640_s4, 128, %s650_s16, %s182_s6  }
  0x6b PF: > { %s220_s24 = sand.u32 1, %s492_s9   ;;  %p726_p4 = scmp.ne.s32.totalorder %s721_s22, 0 }
  0x6c   : > { %p727_p5 = scmp.ge.s32.totalorder %s504_s12, 2  ;;  %s221_s26 = scalar_lea.sflag [#allocation4], %s220_s24 }
  0x6e   : > { %p336_p8 = pnand %p727_p5, %p726_p4 }
  0x70   : > { %483 = dma.done.wait (!%p336_p8), %s221_s26, 128  }
  0x71   : > { %485 = vsyncadd (!%p336_p8), %s221_s26, 4294967168  ;;  %s230_s27 = scalar_lea.sflag [#allocation7], %s220_s24 }
  0x72   : > { %487 = dma.done.wait (!%p336_p8), %s230_s27, 128  }
  0x73   : > { %489 = vsyncadd (!%p336_p8), %s230_s27, 4294967168  ;;  %p19_p11 = scmp.ge.s32.totalorder %s549_s15, 4   ;;  %s728_s9 = smov %s496_s10 }
  0x74   : > { %s729_s10 = smov %s500_s11  ;;  %s730_s11 = smov %s561_s18 }
  0x75   : > { %s731_s12 = smov %s549_s15  ;;  %21 = sbr.rel (!%p19_p11) target bundleno = 7 (0x7), region = 86 }
  0x7c   :  { %235 = vsyncpa [#allocation3], 1 }
  0x7d   :  { %237 = vsyncpa [#allocation3 + $0x1], 1 }
  0x7e   :  { %238 = vsyncpa [#allocation4], 1 }
  0x7f   :  { %240 = vsyncpa [#allocation4 + $0x1], 1 }
  0x80   :  { %241 = vsyncpa [#allocation7], 1 }
  0x81   :  { %243 = vsyncpa [#allocation7 + $0x1], 1 }

</bundles_post_ra>
